<compile_context>
chip_gen: v7x
topology: tpu7x:2x2x1
jax: 0.10.0
libtpu: 0.0.40
codegen_flags: <defaults>
</compile_context>

<pallas_src>
import numpy as np
import jax
import jax.numpy as jnp
from jax.experimental import pallas as pl
from jax.experimental.pallas import tpu as pltpu


def _conv_gemm_kernel(xcol_ref, w_ref, b_ref, o_ref):
    """One (sample, spatial-tile, cout-tile) block.

    xcol_ref : (1, K, THW)    bf16 im2col patches, K = kh*kw*Cin, THW lane-dense
    w_ref    : (TCO, K)       bf16 weight tile, tap-major / channel-minor
    b_ref    : (TCO, 1)       f32 bias column (zeros when is_bias=False)
    o_ref    : (1, TCO, THW)  f32 output tile
    """
    acc = jnp.dot(w_ref[...], xcol_ref[0], preferred_element_type=jnp.float32)
    o_ref[0] = (acc + b_ref[...]).astype(o_ref.dtype)


def _round_up(x, m):
    return (x + m - 1) // m * m


def _cdiv(a, b):
    return -(-a // b)


def _vmem_capacity_bytes():
    try:
        info = pltpu.get_tpu_info()
        cap = int(getattr(info, "vmem_capacity_bytes", 0))
        if cap > 0:
            return cap
    except Exception:
        pass
    return 64 * 1024 * 1024          # conservative fallback (v7x per-TC VMEM)


def single_conv_layer(x, kernel, bias=None, *, stride=1, padding=1,
                      dilation=1, groups=1):
    """Pallas implementation of SingleConvLayer.forward(inputs).

    x      : (N, Cin, H, W)        NCHW, PyTorch convention
    kernel : (Cout, Cin, kh, kw)   conv2d weight layout
    bias   : (Cout,) or None
    """
    assert groups == 1, "only groups=1 is supported"

    n, cin, h, w_in = x.shape
    cout, cin_k, kh, kw = kernel.shape
    assert cin_k == cin

    hout = (h + 2 * padding - dilation * (kh - 1) - 1) // stride + 1
    wout = (w_in + 2 * padding - dilation * (kw - 1) - 1) // stride + 1
    hw = hout * wout
    kdim = kh * kw * cin

    # ---- wrapper-side im2col (bf16): static strided slices, tap-major / channel-minor.
    xp = jnp.pad(x, ((0, 0), (0, 0), (padding, padding), (padding, padding)))
    taps = []
    for dy in range(kh):
        for dx in range(kw):
            y0, x0 = dy * dilation, dx * dilation
            taps.append(xp[:, :,
                           y0: y0 + (hout - 1) * stride + 1: stride,
                           x0: x0 + (wout - 1) * stride + 1: stride])
    # (N, kh*kw, Cin, Hout, Wout) -> (N, K, HW): spatial flattened onto the lane axis.
    x_col = jnp.stack(taps, axis=1).reshape(n, kdim, hw).astype(jnp.bfloat16)

    # ---- weight to (Cout, kh*kw*Cin) matching the tap-major x_col ordering; pad Cout
    #      to the sublane granule so the epilogue/store uses full vregs.
    SUB = 8
    cout_p = _round_up(cout, SUB)
    w2 = jnp.transpose(kernel, (0, 2, 3, 1)).reshape(cout, kdim)
    b1 = bias if bias is not None else jnp.zeros((cout,), jnp.float32)
    if cout_p > cout:
        w2 = jnp.pad(w2, ((0, cout_p - cout), (0, 0)))
        b1 = jnp.pad(b1, (0, cout_p - cout))

    # Cout tiling keeps the resident weight block bounded and MXU-pass shaped.
    tco = cout_p if cout_p <= 256 else 256
    cout_pp = _round_up(cout_p, tco)
    if cout_pp > cout_p:
        w2 = jnp.pad(w2, ((0, cout_pp - cout_p), (0, 0)))
        b1 = jnp.pad(b1, (0, cout_pp - cout_p))
    n_co = cout_pp // tco

    w2 = w2.astype(jnp.bfloat16)
    b2 = b1.reshape(cout_pp, 1).astype(jnp.float32)

    # ---- lane-dense spatial tiling with a generation-aware per-block VMEM budget.
    LANE = 128
    vmem_cap = _vmem_capacity_bytes()
    budget = int(vmem_cap * 0.6)                      # headroom for compiler internals
    w_bufs = 1 if n_co == 1 else 2                    # single-buffer constant weights
    const_bytes = w_bufs * (tco * kdim * 2 + tco * 4)
    per_lane = 2 * kdim * 2 + 2 * tco * 4             # dbl-buffered bf16 xcol + f32 out
    avail = max(budget - const_bytes, per_lane * LANE)
    thw_max = max(LANE, (avail // per_lane) // LANE * LANE)

    hw_r = _round_up(hw, LANE)
    thw = min(hw_r, thw_max)
    # v7x has 2 TensorCores: make sure the parallel grid extent is >= 2 when possible.
    if n * n_co * _cdiv(hw_r, thw) < 2 and hw_r > LANE:
        thw = _round_up(_cdiv(hw_r, 2), LANE)

    hwp = _round_up(hw, thw)
    if hwp > hw:
        x_col = jnp.pad(x_col, ((0, 0), (0, 0), (0, hwp - hw)))

    grid = (n, hwp // thw, n_co)   # cout innermost: x_col block stays resident

    xcol_spec = pl.BlockSpec((1, kdim, thw), lambda i, j, k: (i, 0, j))
    out_spec = pl.BlockSpec((1, tco, thw), lambda i, j, k: (i, k, j))
    w_map = lambda i, j, k: (k, 0)
    b_map = lambda i, j, k: (k, 0)

    flops = 2 * n * cout_pp * kdim * hwp
    bytes_accessed = (x_col.size * 2 + w2.size * 2 + b2.size * 4
                      + n * cout_pp * hwp * 4)
    ce = pl.CostEstimate(flops=flops, transcendentals=0,
                         bytes_accessed=bytes_accessed)
    vmem_limit = min(vmem_cap, budget + (16 << 20))

    def _call(single_buffer_consts):
        if single_buffer_consts:
            w_spec = pl.BlockSpec((tco, kdim), w_map, pipeline_mode=pl.Buffered(1))
            b_spec = pl.BlockSpec((tco, 1), b_map, pipeline_mode=pl.Buffered(1))
        else:
            w_spec = pl.BlockSpec((tco, kdim), w_map)
            b_spec = pl.BlockSpec((tco, 1), b_map)
        return pl.pallas_call(
            _conv_gemm_kernel,
            grid=grid,
            in_specs=[xcol_spec, w_spec, b_spec],
            out_specs=out_spec,
            out_shape=jax.ShapeDtypeStruct((n, cout_pp, hwp), jnp.float32),
            compiler_params=pltpu.CompilerParams(
                dimension_semantics=("parallel", "parallel", "parallel"),
                vmem_limit_bytes=vmem_limit),
            cost_estimate=ce,
        )(x_col, w2, b2)

    try:
        out = _call(single_buffer_consts=(n_co == 1))
    except Exception:
        # Robust fallback: identical math with default (double) buffering.
        out = _call(single_buffer_consts=False)

    return out[:, :cout, :hw].reshape(n, cout, hout, wout)


def _reference(x, kernel, bias, *, stride, padding, dilation, groups=1):
    """Pure-JAX reference mirroring torch.nn.functional.conv2d."""
    out = jax.lax.conv_general_dilated(
        x, kernel,
        window_strides=(stride, stride),
        padding=((padding, padding), (padding, padding)),
        rhs_dilation=(dilation, dilation),
        dimension_numbers=('NCHW', 'OIHW', 'NCHW'),
        feature_group_count=groups)
    if bias is not None:
        out = out + bias.reshape(1, -1, 1, 1)
    return out


if __name__ == "__main__":
    # Small deterministic configuration consistent with SingleConvLayer defaults:
    #   kernel (Cout, Cin, 3, 3), stride=1, padding=1, dilation=1, groups=1, bias.
    N, CIN, COUT, H, W, K = 2, 4, 4, 16, 16, 3
    STRIDE, PAD, DIL = 1, 1, 1

    key = jax.random.PRNGKey(0)
    k1, k2, k3 = jax.random.split(key, 3)
    x = jax.random.normal(k1, (N, CIN, H, W), jnp.float32)
    kernel = jax.random.normal(k2, (COUT, CIN, K, K), jnp.float32) * 0.1
    bias = jax.random.normal(k3, (COUT,), jnp.float32) * 0.1

    out = single_conv_layer(x, kernel, bias, stride=STRIDE, padding=PAD,
                            dilation=DIL, groups=1)
    out = jax.block_until_ready(out)

    ref = _reference(x, kernel, bias, stride=STRIDE, padding=PAD,
                     dilation=DIL, groups=1)
    ref = jax.block_until_ready(ref)

    assert out.shape == ref.shape == (N, COUT, H, W), out.shape
    np.testing.assert_allclose(np.asarray(out), np.asarray(ref),
                               rtol=2e-2, atol=2e-2)
    print("KERNEL_OK")
</pallas_src>

<mosaic_0001>
module attributes {stable_mosaic.version = 11 : i64} {
  func.func @_conv_gemm_kernel(%arg0: i32, %arg1: i32, %arg2: i32, %arg3: memref<1x36x256xbf16, #tpu.memory_space<vmem>>, %arg4: memref<8x36xbf16, #tpu.memory_space<vmem>>, %arg5: memref<8x1xf32, #tpu.memory_space<vmem>>, %arg6: memref<1x8x256xf32, #tpu.memory_space<vmem>>) attributes {dimension_semantics = [#tpu.dimension_semantics<parallel>, #tpu.dimension_semantics<parallel>, #tpu.dimension_semantics<parallel>], iteration_bounds = array<i64: 2, 1, 1>, scalar_prefetch = 0 : i64, scratch_operands = 0 : i64, tpu.core_type = #tpu.core_type<tc>, window_params = [{transform_indices = @transform_0, window_bounds = array<i64: 1, 36, 256>}, {pipeline_mode = #tpu.pipeline_mode<synchronous>, transform_indices = @transform_1, window_bounds = array<i64: 8, 36>}, {pipeline_mode = #tpu.pipeline_mode<synchronous>, transform_indices = @transform_2, window_bounds = array<i64: 8, 1>}, {transform_indices = @transform_3, window_bounds = array<i64: 1, 8, 256>}]} {
    %c0 = arith.constant 0 : index
    %c0_0 = arith.constant 0 : index
    %0 = vector.load %arg4[%c0, %c0_0] : memref<8x36xbf16, #tpu.memory_space<vmem>>, vector<8x36xbf16>
    %c0_1 = arith.constant 0 : index
    %c0_2 = arith.constant 0 : index
    %c0_3 = arith.constant 0 : index
    %1 = vector.load %arg3[%c0_1, %c0_2, %c0_3] : memref<1x36x256xbf16, #tpu.memory_space<vmem>>, vector<1x36x256xbf16>
    %2 = vector.shape_cast %1 : vector<1x36x256xbf16> to vector<36x256xbf16>
    %cst = arith.constant dense<0.000000e+00> : vector<8x256xf32>
    %3 = tpu.matmul %0, %2, %cst {dimension_numbers = #tpu.dot_dimension_numbers<[1], [0], [0], [1], [0, 0, 1, 1], [], []>} : vector<8x36xbf16>, vector<36x256xbf16>, vector<8x256xf32> -> vector<8x256xf32>
    %c0_4 = arith.constant 0 : index
    %c0_5 = arith.constant 0 : index
    %4 = vector.load %arg5[%c0_4, %c0_5] : memref<8x1xf32, #tpu.memory_space<vmem>>, vector<8x1xf32>
    %5 = vector.broadcast %4 : vector<8x1xf32> to vector<8x256xf32>
    %6 = arith.addf %3, %5 : vector<8x256xf32>
    %c0_6 = arith.constant 0 : index
    %c0_7 = arith.constant 0 : index
    %c0_8 = arith.constant 0 : index
    %7 = vector.load %arg6[%c0_6, %c0_7, %c0_8] : memref<1x8x256xf32, #tpu.memory_space<vmem>>, vector<1x8x256xf32>
    %8 = vector.shape_cast %7 : vector<1x8x256xf32> to vector<8x256xf32>
    %9 = vector.shape_cast %6 : vector<8x256xf32> to vector<1x8x256xf32>
    tpu.vector_store %arg6[%c0_6, %c0_7, %c0_8], %9 {strides = array<i32>} : memref<1x8x256xf32, #tpu.memory_space<vmem>>, vector<1x8x256xf32>,
    return
  }
  func.func @transform_0(%arg0: i32, %arg1: i32, %arg2: i32) -> (i32, i32, i32) {
    %c0_i32 = arith.constant 0 : i32
    %c0_i32_0 = arith.constant 0 : i32
    return %arg0, %c0_i32, %arg1 : i32, i32, i32
  }
  func.func @transform_1(%arg0: i32, %arg1: i32, %arg2: i32) -> (i32, i32) {
    %c0_i32 = arith.constant 0 : i32
    %c0_i32_0 = arith.constant 0 : i32
    return %arg2, %c0_i32 : i32, i32
  }
  func.func @transform_2(%arg0: i32, %arg1: i32, %arg2: i32) -> (i32, i32) {
    %c0_i32 = arith.constant 0 : i32
    %c0_i32_0 = arith.constant 0 : i32
    return %arg2, %c0_i32 : i32, i32
  }
  func.func @transform_3(%arg0: i32, %arg1: i32, %arg2: i32) -> (i32, i32, i32) {
    %c0_i32 = arith.constant 0 : i32
    return %arg0, %arg2, %arg1 : i32, i32, i32
  }
}

module attributes {stable_mosaic.version = 11 : i64} {
  func.func @_conv_gemm_kernel(%arg0: i32, %arg1: i32, %arg2: i32, %arg3: memref<1x36x256xbf16, #tpu.memory_space<vmem>>, %arg4: memref<8x36xbf16, #tpu.memory_space<vmem>>, %arg5: memref<8x1xf32, #tpu.memory_space<vmem>>, %arg6: memref<1x8x256xf32, #tpu.memory_space<vmem>>) attributes {dimension_semantics = [#tpu.dimension_semantics<parallel>, #tpu.dimension_semantics<parallel>, #tpu.dimension_semantics<parallel>], iteration_bounds = array<i64: 2, 1, 1>, scalar_prefetch = 0 : i64, scratch_operands = 0 : i64, tpu.core_type = #tpu.core_type<tc>, window_params = [{transform_indices = @transform_0, window_bounds = array<i64: 1, 36, 256>}, {transform_indices = @transform_1, window_bounds = array<i64: 8, 36>}, {transform_indices = @transform_2, window_bounds = array<i64: 8, 1>}, {transform_indices = @transform_3, window_bounds = array<i64: 1, 8, 256>}]} {
    %c0 = arith.constant 0 : index
    %c0_0 = arith.constant 0 : index
    %0 = vector.load %arg4[%c0, %c0_0] : memref<8x36xbf16, #tpu.memory_space<vmem>>, vector<8x36xbf16>
    %c0_1 = arith.constant 0 : index
    %c0_2 = arith.constant 0 : index
    %c0_3 = arith.constant 0 : index
    %1 = vector.load %arg3[%c0_1, %c0_2, %c0_3] : memref<1x36x256xbf16, #tpu.memory_space<vmem>>, vector<1x36x256xbf16>
    %2 = vector.shape_cast %1 : vector<1x36x256xbf16> to vector<36x256xbf16>
    %cst = arith.constant dense<0.000000e+00> : vector<8x256xf32>
    %3 = tpu.matmul %0, %2, %cst {dimension_numbers = #tpu.dot_dimension_numbers<[1], [0], [0], [1], [0, 0, 1, 1], [], []>} : vector<8x36xbf16>, vector<36x256xbf16>, vector<8x256xf32> -> vector<8x256xf32>
    %c0_4 = arith.constant 0 : index
    %c0_5 = arith.constant 0 : index
    %4 = vector.load %arg5[%c0_4, %c0_5] : memref<8x1xf32, #tpu.memory_space<vmem>>, vector<8x1xf32>
    %5 = vector.broadcast %4 : vector<8x1xf32> to vector<8x256xf32>
    %6 = arith.addf %3, %5 : vector<8x256xf32>
    %c0_6 = arith.constant 0 : index
    %c0_7 = arith.constant 0 : index
    %c0_8 = arith.constant 0 : index
    %7 = vector.load %arg6[%c0_6, %c0_7, %c0_8] : memref<1x8x256xf32, #tpu.memory_space<vmem>>, vector<1x8x256xf32>
    %8 = vector.shape_cast %7 : vector<1x8x256xf32> to vector<8x256xf32>
    %9 = vector.shape_cast %6 : vector<8x256xf32> to vector<1x8x256xf32>
    tpu.vector_store %arg6[%c0_6, %c0_7, %c0_8], %9 {strides = array<i32>} : memref<1x8x256xf32, #tpu.memory_space<vmem>>, vector<1x8x256xf32>,
    return
  }
  func.func @transform_0(%arg0: i32, %arg1: i32, %arg2: i32) -> (i32, i32, i32) {
    %c0_i32 = arith.constant 0 : i32
    %c0_i32_0 = arith.constant 0 : i32
    return %arg0, %c0_i32, %arg1 : i32, i32, i32
  }
  func.func @transform_1(%arg0: i32, %arg1: i32, %arg2: i32) -> (i32, i32) {
    %c0_i32 = arith.constant 0 : i32
    %c0_i32_0 = arith.constant 0 : i32
    return %arg2, %c0_i32 : i32, i32
  }
  func.func @transform_2(%arg0: i32, %arg1: i32, %arg2: i32) -> (i32, i32) {
    %c0_i32 = arith.constant 0 : i32
    %c0_i32_0 = arith.constant 0 : i32
    return %arg2, %c0_i32 : i32, i32
  }
  func.func @transform_3(%arg0: i32, %arg1: i32, %arg2: i32) -> (i32, i32, i32) {
    %c0_i32 = arith.constant 0 : i32
    return %arg0, %arg2, %arg1 : i32, i32, i32
  }
}

</mosaic_0001>

<bundles_post_ra>
// kernel: tpu_custom_call.1
= control target key start
LH: loop header
LB: loop body
LE: loop exit
PB: predicated region body
PF: predicated region fallthrough
CT: control target
= control target key end

     0   :  { %8 = vsyncpa [#allocation3], 0  ;;  %s774_s0 = inlined_call_operand.vmem [shape: bf16[2,36,256], index: 0, kind: input, shape index: {}]   ;;  %s775_s1 = inlined_call_operand.vmem [shape: bf16[8,36], index: 1, kind: input, shape index: {}]   ;;  %s776_s2 = inlined_call_operand.vmem [shape: f32[8,1], index: 2, kind: input, shape index: {}]   ;;  %s777_s3 = inlined_call_operand.hbm [shape: f32[2,8,256], index: 3, kind: output, shape index: {}]  }
   0x1   :  { %10 = vsyncpa [#allocation3 + $0x1], 0  ;;  %s656_s12 = smov 0   ;;  %s658_s13 = smov 0  }
   0x2   :  { %s660_s14 = smov 0   ;;  %s662_s15 = smov 0  }
   0x3   :  { %s664_s16 = smov 0   ;;  %s666_s17 = smov 0  }
   0x4 LB: > { %s465_s18 = sadd.s32 4294967295, %s632_s17   ;;  %s466_s19 = sadd.s32 4294967294, %s632_s17   ;;  %s632_s17 = sphi %s666_s17, %s16_s17   ;;  %s628_s16 = sphi %s664_s16, %s784_s16   ;;  %s624_s15 = sphi %s662_s15, %s783_s15   ;;  %s620_s14 = sphi %s660_s14, %s782_s14   ;;  %s616_s13 = sphi %s658_s13, %s781_s13   ;;  %s612_s12 = sphi %s656_s12, %s780_s12  }
   0x5   : > { %s35_s20 = sadd.s32 1, %s628_s16  ;;  %s126_s21 = sadd.s32 1, %s620_s14 }
   0x6   : > { %p37_p0 = scmp.ge.s32.totalorder %s35_s20, 2  ;;  %p136_p1 = scmp.ne.s32.totalorder %s620_s14, %s616_s13 }
   0x7   : > { %p137_p2 = scmp.eq.s32.totalorder %s465_s18, 1  ;;  %p142_p3 = scmp.ne.s32.totalorder %s616_s13, %s612_s12 }
   0x8   : > { %s786_s20 = smov (%p37_p0, %s35_s20), 0  ;;  %p143_p5 = scmp.eq.s32.totalorder %s466_s19, 1 }
   0x9   : > { %p696_p4 = por %p137_p2, %p136_p1  ;;  %s119_s23 = ssub.s32 %s628_s16, %s786_s20 }
   0xa   : > { %p471_p6 = scmp.ge.s32.totalorder %s632_s17, 1  ;;  %p124_p7 = scmp.eq.s32.totalorder %s119_s23, 0 }
   0xb   : > { %p703_p8 = por %p143_p5, %p142_p3  ;;  %p188_p9 = scmp.lt.s32.totalorder %s632_s17, 3 }
   0xc   : > { %s709_s25 = scalar_select %p124_p7, %s620_s14, %s126_s21  }
   0xd   : > { %p189_p10 = pnand %p471_p6, %p188_p9 }
   0xe   : > { %p225_p11 = scmp.lt.s32.totalorder (!%p189_p10), %s624_s15, 1  ;;  %v634_v0 = vmov (!%p189_p10), 0   ;;  %v250_v1 = vld [vmem:[%s776_s2] sm:$0xff] (!%p189_p10)  ;;  %vm285_vm0 = vcmask (!%p189_p10), 1041408   ;;  %vm281_vm1 = vcmask (!%p189_p10), 293888   ;;  %s221_s8 = sand.u32 (!%p189_p10), 1, %s616_s13  }
   0xf   : > { %192 = sbr.rel (%p189_p10) target bundleno = 269 (0x10d), region = 32  ;;  %324 = vmatprep.mubr.bf16.mxu0 (!%p189_p10), %v634_v0  ;;  %545 = vset.pattern.permute.xlu0 (!%p189_p10), %v634_v0  ;;  %v244_v10 = vld [vmem:[%s775_s1] sm:$0xf] (!%p189_p10)  ;;  %s472_s9 = sshll.u32 (!%p189_p10), %s221_s8, 4 }
  0x10   : > { %253 = vperm.xlu0 (!%p189_p10), %545, %v250_v1   ;;  %s487_s10 = sshll.u32 (!%p189_p10), %s624_s15, 8  ;;  %s223_s11 = scalar_lea.vmem (!%p189_p10), [#allocation2], %s472_s9 }
  0x11   : > { %s354_s18 = sshll.u32 (!%p189_p10), %s223_s11, 4  ;;  %s727_s23 = scalar_lea.hbm (!%p189_p10), %s777_s3, %s487_s10  ;;  %s729_s18 = int_to_ptr.vmem [resolvable:$true] %s354_s18 }
  0x12   : > { %s554_s26 = scalar_lea.vmem (!%p189_p10), %s729_s18, 256  ;;  %s635_s27 = smov (!%p189_p10), [#allocation2]  }
  0x13   : > { %p555_p12 = scmp.ne.s32.totalorder (!%p189_p10), %s729_s18, %s554_s26 }
  0x15   : > { %p556_p13 = pnand (!%p189_p10), %p555_p12, %p696_p4 }
  0x16   : > { %s226_s28 = scalar_select %p225_p11, %s624_s15, 1 }
  0x17   : > { %s336_s15 = scalar_lea.sflag [#allocation3], %s221_s8  ;;  %p557_p0 = pneg %p556_p13 }
  0x18   : > { %s488_s29 = smul.u32 40, %s226_s28  ;;  %s558_s28 = sshll.u32 %s635_s27, 4  ;;  %s559_s28 = int_to_ptr.vmem [resolvable:$false] %s558_s28 }
  0x19   : > { %p561_p1 = scmp.lt.s32.totalorder %s729_s18, %s559_s28 }
  0x1a   : > { %s232_s5 = scalar_lea.vmem %s774_s0, %s488_s29  ;;  %s560_s29 = scalar_lea.vmem %s559_s28, 512 }
  0x1b   : > { %v546_v2 = vld [vmem:[%s232_s5 + $0x4] ss:$8 sps:$4 sm:$0xff]   ;;  %v548_v3 = vld [vmem:[%s232_s5] ss:$8 sps:$4 sm:$0xff]   ;;  %v549_v4 = vld [vmem:[%s232_s5 + $0x14] ss:$8 sps:$4 sm:$0xff]   ;;  %p562_p2 = scmp.lt.s32.totalorder %s560_s29, %s554_s26 }
  0x1c   : > { %292 = vmatprep.subr.bf16.mxu0 %v546_v2  ;;  %v249_v5 = vld [vmem:[%s232_s5 + $0x20] sm:$0x33]  ;;  %v551_v6 = vld [vmem:[%s232_s5 + $0x10] ss:$8 sps:$4 sm:$0xff]  }
  0x1d   : > { %293 = vmatpush1.bf16.msra.mxu0 %v548_v3  ;;  %v479_v7 = vcombine.high %v249_v5, %v249_v5  ;;  %v478_v8 = vcombine.low %v249_v5, %v249_v5  ;;  %p563_p3 = por %p562_p2, %p561_p1 }
  0x1e   : > { %294 = vmatprep.subr.bf16.mxu0 %v549_v4 }
  0x1f   : > { %v287_v9 = vsel %vm285_vm0, %v478_v8, 0  ;;  %p564_p5 = pnand %p563_p3, %p557_p0 }
  0x21   : > { %295 = vmatpush1.bf16.msra.mxu0 %v551_v6 }
  0x22   : > { %480 = vmatprep.subr.msk.bf16.mxu0 %vm285_vm0, %v479_v7 }
  0x25   : > { %297 = vmatpush1.bf16.msra.mxu0 %v287_v9 }
  0x28   : > { %481 = vmatmul.mubr.msk.bf16.vlgmr.msra.gmra.mrb[0].mxu0 %vm281_vm1, %v244_v10 }
  0x8f   : > { %v254_v11 = vpop.permute.xlu0 %253 }
  0xfb   : > { %v326_v12 = vpop.f32.mrb[0].mxu0 }
  0xfc   : > { %v327_v13 = vadd.f32 %v326_v12, %v254_v11  ;;  %v328_v14 = vpop.f32.mrb[1].mxu0 }
  0xfd   : > { %v329_v15 = vadd.f32 %v328_v14, %v254_v11  ;;  %v330_v16 = vpop.f32.mrb[2].mxu0 }
  0xfe   : > { %333 = vst [vmem:[%s223_s11] sm:$0xff] %v327_v13  ;;  %v331_v17 = vpop.f32.mrb[3].mxu0 }
  0xff   : > { %334 = vst [vmem:[%s223_s11 + $0x8] sm:$0xff] %v329_v15 }
 0x100   : > { %567 = shalt.err (!%p564_p5)
}
 0x101   : > { %s568_s30 = scalar_lea.hbm %s727_s23, 256  ;;  %s572_s6 = scalar_lea.hbm %s777_s3, 512 }
 0x102   : > { %p569_p6 = scmp.ne.s32.totalorder %s727_s23, %s568_s30  ;;  %p573_p10 = scmp.lt.u32.totalorder %s727_s23, %s777_s3 }
 0x103   : > { %p574_p11 = scmp.lt.u32.totalorder %s572_s6, %s568_s30  ;;  %p576_p13 = scmp.lt.u32.totalorder %s568_s30, %s727_s23 }
 0x104   : > { %p570_p7 = pnand %p569_p6, %p696_p4 }
 0x105   : > { %p575_p12 = por %p574_p11, %p573_p10 }
 0x106   : > { %p571_p9 = pneg %p570_p7 }
 0x107   : > { %p577_p0 = por %p576_p13, %p575_p12 }
 0x109   : > { %p578_p1 = pnand %p577_p0, %p571_p9 }
 0x10b   : > { %581 = shalt.err (!%p578_p1)
}
 0x10c   : > { %489 = dma.vmem_to_hbm [thread:$0]  (%p696_p4), %s729_s18, 256, %s727_s23, %s336_s15  }
 0x10d PF: > { %p495_p2 = scmp.ge.s32.totalorder %s632_s17, 2  ;;  %s366_s9 = sand.u32 1, %s612_s12  }
 0x10e   : > { %s367_s10 = scalar_lea.sflag [#allocation3], %s366_s9 }
 0x10f   : > { %p492_p3 = pnand %p495_p2, %p703_p8 }
 0x111   : > { %607 = dma.done.wait (!%p492_p3), %s367_s10, 256  }
 0x112   : > { %609 = vsyncadd (!%p492_p3), %s367_s10, 4294967040  ;;  %s16_s17 = sadd.s32 1, %s632_s17   ;;  %s780_s12 = smov %s616_s13 }
 0x113   : > { %p13_p5 = scmp.ge.s32.totalorder %s16_s17, 4   ;;  %s781_s13 = smov %s620_s14 }
 0x114   : > { %s782_s14 = smov %s709_s25  ;;  %s783_s15 = smov %s628_s16 }
 0x115   : > { %s784_s16 = smov %s786_s20  ;;  %15 = sbr.rel (!%p13_p5) target bundleno = 4 (0x4), region = 73 }
 0x11c   :  { %372 = vsyncpa [#allocation3], 1 }
 0x11d   :  { %374 = vsyncpa [#allocation3 + $0x1], 1 }

// kernel: tpu_custom_call.1
= control target key start
LH: loop header
LB: loop body
LE: loop exit
PB: predicated region body
PF: predicated region fallthrough
CT: control target
= control target key end

     0   :  { %8 = vsyncpa [#allocation3], 0  ;;  %s774_s0 = inlined_call_operand.vmem [shape: bf16[2,36,256], index: 0, kind: input, shape index: {}]   ;;  %s775_s1 = inlined_call_operand.vmem [shape: bf16[8,36], index: 1, kind: input, shape index: {}]   ;;  %s776_s2 = inlined_call_operand.vmem [shape: f32[8,1], index: 2, kind: input, shape index: {}]   ;;  %s777_s3 = inlined_call_operand.hbm [shape: f32[2,8,256], index: 3, kind: output, shape index: {}]  }
   0x1   :  { %10 = vsyncpa [#allocation3 + $0x1], 0  ;;  %s656_s12 = smov 0   ;;  %s658_s13 = smov 0  }
   0x2   :  { %s660_s14 = smov 0   ;;  %s662_s15 = smov 0  }
   0x3   :  { %s664_s16 = smov 0   ;;  %s666_s17 = smov 0  }
   0x4 LB: > { %s465_s18 = sadd.s32 4294967295, %s632_s17   ;;  %s466_s19 = sadd.s32 4294967294, %s632_s17   ;;  %s632_s17 = sphi %s666_s17, %s16_s17   ;;  %s628_s16 = sphi %s664_s16, %s784_s16   ;;  %s624_s15 = sphi %s662_s15, %s783_s15   ;;  %s620_s14 = sphi %s660_s14, %s782_s14   ;;  %s616_s13 = sphi %s658_s13, %s781_s13   ;;  %s612_s12 = sphi %s656_s12, %s780_s12  }
   0x5   : > { %s35_s20 = sadd.s32 1, %s628_s16  ;;  %s126_s21 = sadd.s32 1, %s620_s14 }
   0x6   : > { %p37_p0 = scmp.ge.s32.totalorder %s35_s20, 2  ;;  %p136_p1 = scmp.ne.s32.totalorder %s620_s14, %s616_s13 }
   0x7   : > { %p137_p2 = scmp.eq.s32.totalorder %s465_s18, 1  ;;  %p142_p3 = scmp.ne.s32.totalorder %s616_s13, %s612_s12 }
   0x8   : > { %s786_s20 = smov (%p37_p0, %s35_s20), 0  ;;  %p143_p5 = scmp.eq.s32.totalorder %s466_s19, 1 }
   0x9   : > { %p696_p4 = por %p137_p2, %p136_p1  ;;  %s119_s23 = ssub.s32 %s628_s16, %s786_s20 }
   0xa   : > { %p471_p6 = scmp.ge.s32.totalorder %s632_s17, 1  ;;  %p124_p7 = scmp.eq.s32.totalorder %s119_s23, 0 }
   0xb   : > { %p703_p8 = por %p143_p5, %p142_p3  ;;  %p188_p9 = scmp.lt.s32.totalorder %s632_s17, 3 }
   0xc   : > { %s709_s25 = scalar_select %p124_p7, %s620_s14, %s126_s21  }
   0xd   : > { %p189_p10 = pnand %p471_p6, %p188_p9 }
   0xe   : > { %p225_p11 = scmp.lt.s32.totalorder (!%p189_p10), %s624_s15, 1  ;;  %v634_v0 = vmov (!%p189_p10), 0   ;;  %v250_v1 = vld [vmem:[%s776_s2] sm:$0xff] (!%p189_p10)  ;;  %vm285_vm0 = vcmask (!%p189_p10), 1041408   ;;  %vm281_vm1 = vcmask (!%p189_p10), 293888   ;;  %s221_s8 = sand.u32 (!%p189_p10), 1, %s616_s13  }
   0xf   : > { %192 = sbr.rel (%p189_p10) target bundleno = 269 (0x10d), region = 32  ;;  %324 = vmatprep.mubr.bf16.mxu0 (!%p189_p10), %v634_v0  ;;  %545 = vset.pattern.permute.xlu0 (!%p189_p10), %v634_v0  ;;  %v244_v10 = vld [vmem:[%s775_s1] sm:$0xf] (!%p189_p10)  ;;  %s472_s9 = sshll.u32 (!%p189_p10), %s221_s8, 4 }
  0x10   : > { %253 = vperm.xlu0 (!%p189_p10), %545, %v250_v1   ;;  %s487_s10 = sshll.u32 (!%p189_p10), %s624_s15, 8  ;;  %s223_s11 = scalar_lea.vmem (!%p189_p10), [#allocation2], %s472_s9 }
  0x11   : > { %s354_s18 = sshll.u32 (!%p189_p10), %s223_s11, 4  ;;  %s727_s23 = scalar_lea.hbm (!%p189_p10), %s777_s3, %s487_s10  ;;  %s729_s18 = int_to_ptr.vmem [resolvable:$true] %s354_s18 }
  0x12   : > { %s554_s26 = scalar_lea.vmem (!%p189_p10), %s729_s18, 256  ;;  %s635_s27 = smov (!%p189_p10), [#allocation2]  }
  0x13   : > { %p555_p12 = scmp.ne.s32.totalorder (!%p189_p10), %s729_s18, %s554_s26 }
  0x15   : > { %p556_p13 = pnand (!%p189_p10), %p555_p12, %p696_p4 }
  0x16   : > { %s226_s28 = scalar_select %p225_p11, %s624_s15, 1 }
  0x17   : > { %s336_s15 = scalar_lea.sflag [#allocation3], %s221_s8  ;;  %p557_p0 = pneg %p556_p13 }
  0x18   : > { %s488_s29 = smul.u32 40, %s226_s28  ;;  %s558_s28 = sshll.u32 %s635_s27, 4  ;;  %s559_s28 = int_to_ptr.vmem [resolvable:$false] %s558_s28 }
  0x19   : > { %p561_p1 = scmp.lt.s32.totalorder %s729_s18, %s559_s28 }
  0x1a   : > { %s232_s5 = scalar_lea.vmem %s774_s0, %s488_s29  ;;  %s560_s29 = scalar_lea.vmem %s559_s28, 512 }
  0x1b   : > { %v546_v2 = vld [vmem:[%s232_s5 + $0x4] ss:$8 sps:$4 sm:$0xff]   ;;  %v548_v3 = vld [vmem:[%s232_s5] ss:$8 sps:$4 sm:$0xff]   ;;  %v549_v4 = vld [vmem:[%s232_s5 + $0x14] ss:$8 sps:$4 sm:$0xff]   ;;  %p562_p2 = scmp.lt.s32.totalorder %s560_s29, %s554_s26 }
  0x1c   : > { %292 = vmatprep.subr.bf16.mxu0 %v546_v2  ;;  %v249_v5 = vld [vmem:[%s232_s5 + $0x20] sm:$0x33]  ;;  %v551_v6 = vld [vmem:[%s232_s5 + $0x10] ss:$8 sps:$4 sm:$0xff]  }
  0x1d   : > { %293 = vmatpush1.bf16.msra.mxu0 %v548_v3  ;;  %v479_v7 = vcombine.high %v249_v5, %v249_v5  ;;  %v478_v8 = vcombine.low %v249_v5, %v249_v5  ;;  %p563_p3 = por %p562_p2, %p561_p1 }
  0x1e   : > { %294 = vmatprep.subr.bf16.mxu0 %v549_v4 }
  0x1f   : > { %v287_v9 = vsel %vm285_vm0, %v478_v8, 0  ;;  %p564_p5 = pnand %p563_p3, %p557_p0 }
  0x21   : > { %295 = vmatpush1.bf16.msra.mxu0 %v551_v6 }
  0x22   : > { %480 = vmatprep.subr.msk.bf16.mxu0 %vm285_vm0, %v479_v7 }
  0x25   : > { %297 = vmatpush1.bf16.msra.mxu0 %v287_v9 }
  0x28   : > { %481 = vmatmul.mubr.msk.bf16.vlgmr.msra.gmra.mrb[0].mxu0 %vm281_vm1, %v244_v10 }
  0x8f   : > { %v254_v11 = vpop.permute.xlu0 %253 }
  0xfb   : > { %v326_v12 = vpop.f32.mrb[0].mxu0 }
  0xfc   : > { %v327_v13 = vadd.f32 %v326_v12, %v254_v11  ;;  %v328_v14 = vpop.f32.mrb[1].mxu0 }
  0xfd   : > { %v329_v15 = vadd.f32 %v328_v14, %v254_v11  ;;  %v330_v16 = vpop.f32.mrb[2].mxu0 }
  0xfe   : > { %333 = vst [vmem:[%s223_s11] sm:$0xff] %v327_v13  ;;  %v331_v17 = vpop.f32.mrb[3].mxu0 }
  0xff   : > { %334 = vst [vmem:[%s223_s11 + $0x8] sm:$0xff] %v329_v15 }
 0x100   : > { %567 = shalt.err (!%p564_p5)
}
 0x101   : > { %s568_s30 = scalar_lea.hbm %s727_s23, 256  ;;  %s572_s6 = scalar_lea.hbm %s777_s3, 512 }
 0x102   : > { %p569_p6 = scmp.ne.s32.totalorder %s727_s23, %s568_s30  ;;  %p573_p10 = scmp.lt.u32.totalorder %s727_s23, %s777_s3 }
 0x103   : > { %p574_p11 = scmp.lt.u32.totalorder %s572_s6, %s568_s30  ;;  %p576_p13 = scmp.lt.u32.totalorder %s568_s30, %s727_s23 }
 0x104   : > { %p570_p7 = pnand %p569_p6, %p696_p4 }
 0x105   : > { %p575_p12 = por %p574_p11, %p573_p10 }
 0x106   : > { %p571_p9 = pneg %p570_p7 }
 0x107   : > { %p577_p0 = por %p576_p13, %p575_p12 }
 0x109   : > { %p578_p1 = pnand %p577_p0, %p571_p9 }
 0x10b   : > { %581 = shalt.err (!%p578_p1)
}
 0x10c   : > { %489 = dma.vmem_to_hbm [thread:$0]  (%p696_p4), %s729_s18, 256, %s727_s23, %s336_s15  }
 0x10d PF: > { %p495_p2 = scmp.ge.s32.totalorder %s632_s17, 2  ;;  %s366_s9 = sand.u32 1, %s612_s12  }
 0x10e   : > { %s367_s10 = scalar_lea.sflag [#allocation3], %s366_s9 }
 0x10f   : > { %p492_p3 = pnand %p495_p2, %p703_p8 }
 0x111   : > { %607 = dma.done.wait (!%p492_p3), %s367_s10, 256  }
 0x112   : > { %609 = vsyncadd (!%p492_p3), %s367_s10, 4294967040  ;;  %s16_s17 = sadd.s32 1, %s632_s17   ;;  %s780_s12 = smov %s616_s13 }
 0x113   : > { %p13_p5 = scmp.ge.s32.totalorder %s16_s17, 4   ;;  %s781_s13 = smov %s620_s14 }
 0x114   : > { %s782_s14 = smov %s709_s25  ;;  %s783_s15 = smov %s628_s16 }
 0x115   : > { %s784_s16 = smov %s786_s20  ;;  %15 = sbr.rel (!%p13_p5) target bundleno = 4 (0x4), region = 73 }
 0x11c   :  { %372 = vsyncpa [#allocation3], 1 }
 0x11d   :  { %374 = vsyncpa [#allocation3 + $0x1], 1 }

</bundles_post_ra>
